<compile_context>
chip_gen: v7x
topology: tpu7x:2x2x1
jax: 0.10.0
libtpu: 0.0.40
codegen_flags: <defaults>
</compile_context>

<pallas_src>
import functools

import numpy as np
import jax
import jax.numpy as jnp
from jax import lax
from jax.experimental import pallas as pl
from jax.experimental.pallas import tpu as pltpu


def make_divisible(v, divisor=8, min_value=None):
    if min_value is None:
        min_value = divisor
    new_v = max(min_value, int(v + divisor / 2) // divisor * divisor)
    if new_v < 0.9 * v:
        new_v += divisor
    return new_v


def _silu(x):
    # SiLU with sigmoid lowered via a single tanh (one EUP transcendental push
    # instead of exp + divide).
    return x * (0.5 * jnp.tanh(0.5 * x) + 0.5)


# ----------------------------------------------------------------------------
# Pallas kernel
# ----------------------------------------------------------------------------
def _make_kernel(H, W, Cin, Chid, Cout, stride, use_res, use_expand, L, mm_dtype):
    """L = Bt*HW: the folded (batch x spatial) lane axis of one grid step."""

    def kernel(*refs):
        if stride == 2:
            (x_ref, w1_ref, b1_ref, dw_ref, m_ref, b2_ref,
             w2_ref, b3_ref, sel_ref, o_ref) = refs
        else:
            (x_ref, w1_ref, b1_ref, dw_ref, m_ref, b2_ref,
             w2_ref, b3_ref, o_ref) = refs
            sel_ref = None

        xb = x_ref[0]                              # (Cin, L) - whole batch block
        taps = dw_ref[...]                         # (9, Chid, 1)  BN scale folded
        masks = m_ref[...]                         # (9, 1, L)     0/1 border masks
        b2 = b2_ref[...]                           # (Chid, 1)
        w2 = w2_ref[...].astype(mm_dtype)          # (Cout, Chid)  BN scale folded
        b3 = b3_ref[...]                           # (Cout, 1)

        # ---- 1x1 expand conv (+folded BN) + SiLU: one wide MXU matmul ----------
        if use_expand:
            w1 = w1_ref[...].astype(mm_dtype)      # (Chid, Cin)   BN scale folded
            h = jnp.dot(w1, xb.astype(mm_dtype),
                        preferred_element_type=jnp.float32)        # (Chid, L)
            h = _silu(h + b1_ref[...])
        else:
            h = xb                                                  # Chid == Cin

        # ---- 3x3 depthwise conv, pad=1: XLU lane rolls + 0/1 border masks ------
        # Cross-image wraps along the folded lane axis land exactly on positions
        # the per-image border masks zero out, so one roll covers the whole block.
        acc = None
        for kh in range(3):
            for kw in range(3):
                k = kh * 3 + kw
                s = (kh - 1) * W + (kw - 1)        # flat offset of the source pixel
                if s == 0:
                    contrib = h * taps[k]
                else:
                    shifted = pltpu.roll(h, shift=(-s) % L, axis=1)
                    contrib = shifted * masks[k] * taps[k]
                acc = contrib if acc is None else acc + contrib
        acc = _silu(acc + b2)

        # ---- 1x1 reduce conv (+folded BN), optional stride-2 selection ---------
        if stride == 1:
            y = jnp.dot(w2, acc.astype(mm_dtype),
                        preferred_element_type=jnp.float32)        # (Cout, L)
            if use_res:
                y = y + xb
        else:
            sel = sel_ref[...].astype(mm_dtype)    # (L, Lo) block-diag 0/1 selector
            if Cout <= Chid:
                # Reduce first, then select: selection runs on the smaller Cout rows.
                y = jnp.dot(w2, acc.astype(mm_dtype),
                            preferred_element_type=jnp.float32)    # (Cout, L)
                y = jnp.dot(y.astype(mm_dtype), sel,
                            preferred_element_type=jnp.float32)    # (Cout, Lo)
            else:
                a2 = jnp.dot(acc.astype(mm_dtype), sel,
                             preferred_element_type=jnp.float32)   # (Chid, Lo)
                y = jnp.dot(w2, a2.astype(mm_dtype),
                            preferred_element_type=jnp.float32)    # (Cout, Lo)

        o_ref[0] = (y + b3).astype(o_ref.dtype)

    return kernel


# ----------------------------------------------------------------------------
# Wrapper: NCHW in / NCHW out
# ----------------------------------------------------------------------------
def inverted_residual_pallas(x_nchw, params, *, stride, use_res, use_expand,
                             batch_block=None, matmul_dtype=jnp.float32):
    """x_nchw: (N, Cin, H, W) f32 -> (N, Cout, H//stride, W//stride) f32."""
    N, Cin, H, W = x_nchw.shape
    Chid = params["dw"].shape[-1]
    Cout = params["w2"].shape[1]
    assert stride in (1, 2)
    if not use_expand:
        assert Chid == Cin, "expand_ratio==1 requires hidden_dim == in_channels"
    if use_res:
        assert stride == 1 and Cin == Cout, "residual requires stride=1 and Cin==Cout"
    if stride == 2 and (H % 2 or W % 2):
        raise ValueError("stride=2 path requires even H and W")
    Ho, Wo = H // stride, W // stride
    HW, HWo = H * W, Ho * Wo

    # Images per grid step (folded into the lane axis).  Capped at N//2 so the
    # grid has >= 2 steps and "parallel" can shard across v7x's two TensorCores.
    if batch_block is None:
        cap = max(1, N // 2)
        batch_block = next(c for c in (8, 4, 2, 1) if c <= cap and N % c == 0)
    Bt = batch_block
    assert N % Bt == 0, "batch_block must divide N (pad the batch otherwise)"
    G = N // Bt
    L, Lo = Bt * HW, Bt * HWo

    # Fold the batch block into the lane axis: (G, Cin, Bt*HW).  For Bt == 1 this
    # is a pure reshape; for Bt > 1 a cheap wrapper-side transpose (layout
    # plumbing) that buys one wide matmul per step and full-lane stores.
    x_cm = (x_nchw.reshape(G, Bt, Cin, HW)
                  .transpose(0, 2, 1, 3)
                  .reshape(G, Cin, L))

    # ---- fold BN (eval) scale into conv weights, channel-major layout ---------
    w1_cm = (params["w1"] * params["s1"]).T                              # (Chid, Cin)
    b1_cm = params["b1"].reshape(Chid, 1)
    dw_cm = (params["dw"] * params["s2"]).reshape(9, Chid)[..., None]    # (9, Chid, 1)
    b2_cm = params["b2"].reshape(Chid, 1)
    w2_cm = (params["w2"] * params["s3"]).T                              # (Cout, Chid)
    b3_cm = params["b3"].reshape(Cout, 1)

    # ---- 0/1 border masks for the 9 taps, tiled over the folded batch lanes ----
    rows = np.arange(HW) // W
    cols = np.arange(HW) % W
    masks = np.zeros((9, 1, HW), np.float32)
    for kh in range(3):
        for kw in range(3):
            ok = ((rows + kh - 1 >= 0) & (rows + kh - 1 < H) &
                  (cols + kw - 1 >= 0) & (cols + kw - 1 < W))
            masks[kh * 3 + kw, 0] = ok
    masks = jnp.asarray(np.tile(masks, (1, 1, Bt)))                      # (9, 1, L)

    inputs = [x_cm, w1_cm, b1_cm, dw_cm, masks, b2_cm, w2_cm, b3_cm]
    in_specs = [
        pl.BlockSpec((1, Cin, L), lambda n: (n, 0, 0)),
        pl.BlockSpec((Chid, Cin), lambda n: (0, 0)),
        pl.BlockSpec((Chid, 1), lambda n: (0, 0)),
        pl.BlockSpec((9, Chid, 1), lambda n: (0, 0, 0)),
        pl.BlockSpec((9, 1, L), lambda n: (0, 0, 0)),
        pl.BlockSpec((Chid, 1), lambda n: (0, 0)),
        pl.BlockSpec((Cout, Chid), lambda n: (0, 0)),
        pl.BlockSpec((Cout, 1), lambda n: (0, 0)),
    ]
    if stride == 2:
        # Block-diagonal selector: keep the even (h, w) positions of every image.
        sel = np.zeros((L, Lo), np.float32)
        for b in range(Bt):
            for ho in range(Ho):
                for wo in range(Wo):
                    sel[b * HW + 2 * ho * W + 2 * wo, b * HWo + ho * Wo + wo] = 1.0
        inputs.append(jnp.asarray(sel))
        in_specs.append(pl.BlockSpec((L, Lo), lambda n: (0, 0)))

    kernel = _make_kernel(H, W, Cin, Chid, Cout, stride, use_res, use_expand,
                          L, matmul_dtype)

    out_cm = pl.pallas_call(
        kernel,
        out_shape=jax.ShapeDtypeStruct((G, Cout, Lo), jnp.float32),
        grid=(G,),
        in_specs=in_specs,
        out_specs=pl.BlockSpec((1, Cout, Lo), lambda n: (n, 0, 0)),
        compiler_params=pltpu.CompilerParams(
            dimension_semantics=("parallel",)),     # v7x: shard steps over the 2 TCs
    )(*inputs)

    # Unfold the batch from the lane axis back to NCHW (no-op for Bt == 1).
    return (out_cm.reshape(G, Cout, Bt, HWo)
                  .transpose(0, 2, 1, 3)
                  .reshape(N, Cout, Ho, Wo))


# ----------------------------------------------------------------------------
# Pure-JAX reference (for correctness checking)
# ----------------------------------------------------------------------------
def inverted_residual_reference(x_nchw, params, *, stride, use_res, use_expand):
    x = jnp.transpose(x_nchw, (0, 2, 3, 1))                   # NHWC
    h = x
    if use_expand:
        h = jnp.einsum("nhwc,cd->nhwd", h, params["w1"])
        h = h * params["s1"] + params["b1"]
        h = h * jax.nn.sigmoid(h)
    Chid = params["dw"].shape[-1]
    h = lax.conv_general_dilated(
        h, params["dw"][:, :, None, :],
        window_strides=(stride, stride), padding=((1, 1), (1, 1)),
        dimension_numbers=("NHWC", "HWIO", "NHWC"),
        feature_group_count=Chid)
    h = h * params["s2"] + params["b2"]
    h = h * jax.nn.sigmoid(h)
    y = jnp.einsum("nhwc,cd->nhwd", h, params["w2"])
    y = y * params["s3"] + params["b3"]
    if use_res:
        y = y + x
    return jnp.transpose(y, (0, 3, 1, 2))


# ----------------------------------------------------------------------------
# Deterministic parameter construction (synthetic; mirrors nn.Module shapes)
# ----------------------------------------------------------------------------
def make_params(key, Cin, Cout, Chid, eps=1e-5):
    ks = jax.random.split(key, 16)

    def bn_fold(kg, kb, km, kv, C):
        gamma = 1.0 + 0.1 * jax.random.normal(kg, (1, C), jnp.float32)
        beta = 0.1 * jax.random.normal(kb, (1, C), jnp.float32)
        mean = 0.1 * jax.random.normal(km, (1, C), jnp.float32)
        var = 0.5 + jax.random.uniform(kv, (1, C), jnp.float32)
        scale = gamma / jnp.sqrt(var + eps)
        bias = beta - mean * scale
        return scale, bias

    # 1x1 expand: torch weight (Chid, Cin, 1, 1) -> (Cin, Chid)
    w1 = 0.2 * jax.random.normal(ks[0], (Cin, Chid), jnp.float32)
    s1, b1 = bn_fold(ks[1], ks[2], ks[3], ks[4], Chid)
    # 3x3 depthwise: torch weight (Chid, 1, 3, 3) -> (3, 3, Chid)
    dw = 0.2 * jax.random.normal(ks[5], (3, 3, Chid), jnp.float32)
    s2, b2 = bn_fold(ks[6], ks[7], ks[8], ks[9], Chid)
    # 1x1 reduce: torch weight (Cout, Chid, 1, 1) -> (Chid, Cout)
    w2 = 0.2 * jax.random.normal(ks[10], (Chid, Cout), jnp.float32)
    s3, b3 = bn_fold(ks[11], ks[12], ks[13], ks[14], Cout)

    return dict(w1=w1, s1=s1, b1=b1, dw=dw, s2=s2, b2=b2, w2=w2, s3=s3, b3=b3)


def _check(out, ref, name, atol=1e-4, rtol=1e-4):
    if not jnp.allclose(out, ref, atol=atol, rtol=rtol):
        raise AssertionError(f"{name} mismatch, max err = "
                             f"{float(jnp.max(jnp.abs(out - ref)))}")


if __name__ == "__main__":
    key = jax.random.PRNGKey(0)
    kx, kp, kp2 = jax.random.split(key, 3)

    # Config 1: InvertedResidual(in=4, out=4, stride=1, expand_ratio=4) -> residual
    N, Cin, H, W = 2, 4, 16, 16
    Cout, stride, expand_ratio = 4, 1, 4
    skip_connection = True
    hidden_dim = make_divisible(int(round(Cin * expand_ratio)), 8)      # -> 16
    use_expand = expand_ratio != 1
    use_res = (stride == 1) and (Cin == Cout) and skip_connection

    x = jax.random.normal(kx, (N, Cin, H, W), jnp.float32)
    params = make_params(kp, Cin, Cout, hidden_dim)
    ref = inverted_residual_reference(x, params, stride=stride,
                                      use_res=use_res, use_expand=use_expand)

    # 1a) default batch_block (capped at N//2 -> grid of 2 steps, v7x-friendly)
    run = jax.jit(functools.partial(
        inverted_residual_pallas, stride=stride, use_res=use_res,
        use_expand=use_expand))
    out = run(x, params)
    jax.block_until_ready(out)
    assert out.shape == (N, Cout, H, W), out.shape
    assert out.dtype == jnp.float32
    _check(out, ref, "stride=1 (grid=2) kernel")

    # 1b) batch folded into the lane axis (Bt=2, one wide matmul per step)
    run_fold = jax.jit(functools.partial(
        inverted_residual_pallas, stride=stride, use_res=use_res,
        use_expand=use_expand, batch_block=2))
    out_fold = run_fold(x, params)
    jax.block_until_ready(out_fold)
    _check(out_fold, ref, "stride=1 (batch folded into lanes) kernel")

    # Config 2: stride=2, Cout=8, no residual (reduce-then-select path)
    Cout2, stride2 = 8, 2
    params2 = make_params(kp2, Cin, Cout2, hidden_dim)
    ref2 = inverted_residual_reference(x, params2, stride=stride2,
                                       use_res=False, use_expand=True)

    run2 = jax.jit(functools.partial(
        inverted_residual_pallas, stride=stride2, use_res=False,
        use_expand=True))
    out2 = run2(x, params2)
    jax.block_until_ready(out2)
    assert out2.shape == (N, Cout2, H // 2, W // 2), out2.shape
    _check(out2, ref2, "stride=2 kernel")

    # 2b) stride=2 with batch folded into lanes (lane-dense 128-wide output store)
    run2_fold = jax.jit(functools.partial(
        inverted_residual_pallas, stride=stride2, use_res=False,
        use_expand=True, batch_block=2))
    out2_fold = run2_fold(x, params2)
    jax.block_until_ready(out2_fold)
    _check(out2_fold, ref2, "stride=2 (batch folded into lanes) kernel")

    print("KERNEL_OK")
</pallas_src>

<mosaic_0001>
module attributes {stable_mosaic.version = 11 : i64} {
  func.func @kernel(%arg0: i32, %arg1: memref<1x4x256xf32, #tpu.memory_space<vmem>>, %arg2: memref<16x4xf32, #tpu.memory_space<vmem>>, %arg3: memref<16x1xf32, #tpu.memory_space<vmem>>, %arg4: memref<9x16x1xf32, #tpu.memory_space<vmem>>, %arg5: memref<9x1x256xf32, #tpu.memory_space<vmem>>, %arg6: memref<16x1xf32, #tpu.memory_space<vmem>>, %arg7: memref<4x16xf32, #tpu.memory_space<vmem>>, %arg8: memref<4x1xf32, #tpu.memory_space<vmem>>, %arg9: memref<1x4x256xf32, #tpu.memory_space<vmem>>) attributes {dimension_semantics = [#tpu.dimension_semantics<parallel>], iteration_bounds = array<i64: 2>, scalar_prefetch = 0 : i64, scratch_operands = 0 : i64, tpu.core_type = #tpu.core_type<tc>, window_params = [{transform_indices = @transform_0, window_bounds = array<i64: 1, 4, 256>}, {pipeline_mode = #tpu.pipeline_mode<synchronous>, transform_indices = @transform_1, window_bounds = array<i64: 16, 4>}, {pipeline_mode = #tpu.pipeline_mode<synchronous>, transform_indices = @transform_2, window_bounds = array<i64: 16, 1>}, {pipeline_mode = #tpu.pipeline_mode<synchronous>, transform_indices = @transform_3, window_bounds = array<i64: 9, 16, 1>}, {pipeline_mode = #tpu.pipeline_mode<synchronous>, transform_indices = @transform_4, window_bounds = array<i64: 9, 1, 256>}, {pipeline_mode = #tpu.pipeline_mode<synchronous>, transform_indices = @transform_5, window_bounds = array<i64: 16, 1>}, {pipeline_mode = #tpu.pipeline_mode<synchronous>, transform_indices = @transform_6, window_bounds = array<i64: 4, 16>}, {pipeline_mode = #tpu.pipeline_mode<synchronous>, transform_indices = @transform_7, window_bounds = array<i64: 4, 1>}, {transform_indices = @transform_8, window_bounds = array<i64: 1, 4, 256>}]} {
    %c0 = arith.constant 0 : index
    %c0_0 = arith.constant 0 : index
    %c0_1 = arith.constant 0 : index
    %0 = vector.load %arg1[%c0, %c0_0, %c0_1] : memref<1x4x256xf32, #tpu.memory_space<vmem>>, vector<1x4x256xf32>
    %1 = vector.shape_cast %0 : vector<1x4x256xf32> to vector<4x256xf32>
    %c0_2 = arith.constant 0 : index
    %c0_3 = arith.constant 0 : index
    %c0_4 = arith.constant 0 : index
    %2 = vector.load %arg4[%c0_2, %c0_3, %c0_4] : memref<9x16x1xf32, #tpu.memory_space<vmem>>, vector<9x16x1xf32>
    %c0_5 = arith.constant 0 : index
    %c0_6 = arith.constant 0 : index
    %c0_7 = arith.constant 0 : index
    %3 = vector.load %arg5[%c0_5, %c0_6, %c0_7] : memref<9x1x256xf32, #tpu.memory_space<vmem>>, vector<9x1x256xf32>
    %c0_8 = arith.constant 0 : index
    %c0_9 = arith.constant 0 : index
    %4 = vector.load %arg6[%c0_8, %c0_9] : memref<16x1xf32, #tpu.memory_space<vmem>>, vector<16x1xf32>
    %c0_10 = arith.constant 0 : index
    %c0_11 = arith.constant 0 : index
    %5 = vector.load %arg7[%c0_10, %c0_11] : memref<4x16xf32, #tpu.memory_space<vmem>>, vector<4x16xf32>
    %c0_12 = arith.constant 0 : index
    %c0_13 = arith.constant 0 : index
    %6 = vector.load %arg8[%c0_12, %c0_13] : memref<4x1xf32, #tpu.memory_space<vmem>>, vector<4x1xf32>
    %c0_14 = arith.constant 0 : index
    %c0_15 = arith.constant 0 : index
    %7 = vector.load %arg2[%c0_14, %c0_15] : memref<16x4xf32, #tpu.memory_space<vmem>>, vector<16x4xf32>
    %cst = arith.constant dense<0.000000e+00> : vector<16x256xf32>
    %8 = tpu.matmul %7, %1, %cst {dimension_numbers = #tpu.dot_dimension_numbers<[1], [0], [0], [1], [0, 0, 1, 1], [], []>} : vector<16x4xf32>, vector<4x256xf32>, vector<16x256xf32> -> vector<16x256xf32>
    %c0_16 = arith.constant 0 : index
    %c0_17 = arith.constant 0 : index
    %9 = vector.load %arg3[%c0_16, %c0_17] : memref<16x1xf32, #tpu.memory_space<vmem>>, vector<16x1xf32>
    %10 = vector.broadcast %9 : vector<16x1xf32> to vector<16x256xf32>
    %11 = arith.addf %8, %10 : vector<16x256xf32>
    %cst_18 = arith.constant 5.000000e-01 : f32
    %12 = vector.broadcast %cst_18 : f32 to vector<16x256xf32>
    %13 = arith.mulf %12, %11 : vector<16x256xf32>
    %14 = math.tanh %13 : vector<16x256xf32>
    %cst_19 = arith.constant 5.000000e-01 : f32
    %15 = vector.broadcast %cst_19 : f32 to vector<16x256xf32>
    %16 = arith.mulf %15, %14 : vector<16x256xf32>
    %cst_20 = arith.constant 5.000000e-01 : f32
    %17 = vector.broadcast %cst_20 : f32 to vector<16x256xf32>
    %18 = arith.addf %16, %17 : vector<16x256xf32>
    %19 = arith.mulf %11, %18 : vector<16x256xf32>
    %c17_i32 = arith.constant 17 : i32
    %20 = tpu.dynamic_rotate %19 by %c17_i32 dim 1 : vector<16x256xf32>, i32 -> vector<16x256xf32>
    %21 = vector.extract_strided_slice %3 {offsets = [0, 0, 0], sizes = [1, 1, 256], strides = [1, 1, 1]} : vector<9x1x256xf32> to vector<1x1x256xf32>
    %22 = vector.shape_cast %21 : vector<1x1x256xf32> to vector<1x256xf32>
    %23 = vector.broadcast %22 : vector<1x256xf32> to vector<16x256xf32>
    %24 = arith.mulf %20, %23 : vector<16x256xf32>
    %25 = vector.extract_strided_slice %2 {offsets = [0, 0, 0], sizes = [1, 16, 1], strides = [1, 1, 1]} : vector<9x16x1xf32> to vector<1x16x1xf32>
    %26 = vector.shape_cast %25 : vector<1x16x1xf32> to vector<16x1xf32>
    %27 = vector.broadcast %26 : vector<16x1xf32> to vector<16x256xf32>
    %28 = arith.mulf %24, %27 : vector<16x256xf32>
    %c16_i32 = arith.constant 16 : i32
    %29 = tpu.dynamic_rotate %19 by %c16_i32 dim 1 : vector<16x256xf32>, i32 -> vector<16x256xf32>
    %30 = vector.extract_strided_slice %3 {offsets = [1, 0, 0], sizes = [1, 1, 256], strides = [1, 1, 1]} : vector<9x1x256xf32> to vector<1x1x256xf32>
    %31 = vector.shape_cast %30 : vector<1x1x256xf32> to vector<1x256xf32>
    %32 = vector.broadcast %31 : vector<1x256xf32> to vector<16x256xf32>
    %33 = arith.mulf %29, %32 : vector<16x256xf32>
    %34 = vector.extract_strided_slice %2 {offsets = [1, 0, 0], sizes = [1, 16, 1], strides = [1, 1, 1]} : vector<9x16x1xf32> to vector<1x16x1xf32>
    %35 = vector.shape_cast %34 : vector<1x16x1xf32> to vector<16x1xf32>
    %36 = vector.broadcast %35 : vector<16x1xf32> to vector<16x256xf32>
    %37 = arith.mulf %33, %36 : vector<16x256xf32>
    %38 = arith.addf %28, %37 : vector<16x256xf32>
    %c15_i32 = arith.constant 15 : i32
    %39 = tpu.dynamic_rotate %19 by %c15_i32 dim 1 : vector<16x256xf32>, i32 -> vector<16x256xf32>
    %40 = vector.extract_strided_slice %3 {offsets = [2, 0, 0], sizes = [1, 1, 256], strides = [1, 1, 1]} : vector<9x1x256xf32> to vector<1x1x256xf32>
    %41 = vector.shape_cast %40 : vector<1x1x256xf32> to vector<1x256xf32>
    %42 = vector.broadcast %41 : vector<1x256xf32> to vector<16x256xf32>
    %43 = arith.mulf %39, %42 : vector<16x256xf32>
    %44 = vector.extract_strided_slice %2 {offsets = [2, 0, 0], sizes = [1, 16, 1], strides = [1, 1, 1]} : vector<9x16x1xf32> to vector<1x16x1xf32>
    %45 = vector.shape_cast %44 : vector<1x16x1xf32> to vector<16x1xf32>
    %46 = vector.broadcast %45 : vector<16x1xf32> to vector<16x256xf32>
    %47 = arith.mulf %43, %46 : vector<16x256xf32>
    %48 = arith.addf %38, %47 : vector<16x256xf32>
    %c1_i32 = arith.constant 1 : i32
    %49 = tpu.dynamic_rotate %19 by %c1_i32 dim 1 : vector<16x256xf32>, i32 -> vector<16x256xf32>
    %50 = vector.extract_strided_slice %3 {offsets = [3, 0, 0], sizes = [1, 1, 256], strides = [1, 1, 1]} : vector<9x1x256xf32> to vector<1x1x256xf32>
    %51 = vector.shape_cast %50 : vector<1x1x256xf32> to vector<1x256xf32>
    %52 = vector.broadcast %51 : vector<1x256xf32> to vector<16x256xf32>
    %53 = arith.mulf %49, %52 : vector<16x256xf32>
    %54 = vector.extract_strided_slice %2 {offsets = [3, 0, 0], sizes = [1, 16, 1], strides = [1, 1, 1]} : vector<9x16x1xf32> to vector<1x16x1xf32>
    %55 = vector.shape_cast %54 : vector<1x16x1xf32> to vector<16x1xf32>
    %56 = vector.broadcast %55 : vector<16x1xf32> to vector<16x256xf32>
    %57 = arith.mulf %53, %56 : vector<16x256xf32>
    %58 = arith.addf %48, %57 : vector<16x256xf32>
    %59 = vector.extract_strided_slice %2 {offsets = [4, 0, 0], sizes = [1, 16, 1], strides = [1, 1, 1]} : vector<9x16x1xf32> to vector<1x16x1xf32>
    %60 = vector.shape_cast %59 : vector<1x16x1xf32> to vector<16x1xf32>
    %61 = vector.broadcast %60 : vector<16x1xf32> to vector<16x256xf32>
    %62 = arith.mulf %19, %61 : vector<16x256xf32>
    %63 = arith.addf %58, %62 : vector<16x256xf32>
    %c255_i32 = arith.constant 255 : i32
    %64 = tpu.dynamic_rotate %19 by %c255_i32 dim 1 : vector<16x256xf32>, i32 -> vector<16x256xf32>
    %65 = vector.extract_strided_slice %3 {offsets = [5, 0, 0], sizes = [1, 1, 256], strides = [1, 1, 1]} : vector<9x1x256xf32> to vector<1x1x256xf32>
    %66 = vector.shape_cast %65 : vector<1x1x256xf32> to vector<1x256xf32>
    %67 = vector.broadcast %66 : vector<1x256xf32> to vector<16x256xf32>
    %68 = arith.mulf %64, %67 : vector<16x256xf32>
    %69 = vector.extract_strided_slice %2 {offsets = [5, 0, 0], sizes = [1, 16, 1], strides = [1, 1, 1]} : vector<9x16x1xf32> to vector<1x16x1xf32>
    %70 = vector.shape_cast %69 : vector<1x16x1xf32> to vector<16x1xf32>
    %71 = vector.broadcast %70 : vector<16x1xf32> to vector<16x256xf32>
    %72 = arith.mulf %68, %71 : vector<16x256xf32>
    %73 = arith.addf %63, %72 : vector<16x256xf32>
    %c241_i32 = arith.constant 241 : i32
    %74 = tpu.dynamic_rotate %19 by %c241_i32 dim 1 : vector<16x256xf32>, i32 -> vector<16x256xf32>
    %75 = vector.extract_strided_slice %3 {offsets = [6, 0, 0], sizes = [1, 1, 256], strides = [1, 1, 1]} : vector<9x1x256xf32> to vector<1x1x256xf32>
    %76 = vector.shape_cast %75 : vector<1x1x256xf32> to vector<1x256xf32>
    %77 = vector.broadcast %76 : vector<1x256xf32> to vector<16x256xf32>
    %78 = arith.mulf %74, %77 : vector<16x256xf32>
    %79 = vector.extract_strided_slice %2 {offsets = [6, 0, 0], sizes = [1, 16, 1], strides = [1, 1, 1]} : vector<9x16x1xf32> to vector<1x16x1xf32>
    %80 = vector.shape_cast %79 : vector<1x16x1xf32> to vector<16x1xf32>
    %81 = vector.broadcast %80 : vector<16x1xf32> to vector<16x256xf32>
    %82 = arith.mulf %78, %81 : vector<16x256xf32>
    %83 = arith.addf %73, %82 : vector<16x256xf32>
    %c240_i32 = arith.constant 240 : i32
    %84 = tpu.dynamic_rotate %19 by %c240_i32 dim 1 : vector<16x256xf32>, i32 -> vector<16x256xf32>
    %85 = vector.extract_strided_slice %3 {offsets = [7, 0, 0], sizes = [1, 1, 256], strides = [1, 1, 1]} : vector<9x1x256xf32> to vector<1x1x256xf32>
    %86 = vector.shape_cast %85 : vector<1x1x256xf32> to vector<1x256xf32>
    %87 = vector.broadcast %86 : vector<1x256xf32> to vector<16x256xf32>
    %88 = arith.mulf %84, %87 : vector<16x256xf32>
    %89 = vector.extract_strided_slice %2 {offsets = [7, 0, 0], sizes = [1, 16, 1], strides = [1, 1, 1]} : vector<9x16x1xf32> to vector<1x16x1xf32>
    %90 = vector.shape_cast %89 : vector<1x16x1xf32> to vector<16x1xf32>
    %91 = vector.broadcast %90 : vector<16x1xf32> to vector<16x256xf32>
    %92 = arith.mulf %88, %91 : vector<16x256xf32>
    %93 = arith.addf %83, %92 : vector<16x256xf32>
    %c239_i32 = arith.constant 239 : i32
    %94 = tpu.dynamic_rotate %19 by %c239_i32 dim 1 : vector<16x256xf32>, i32 -> vector<16x256xf32>
    %95 = vector.extract_strided_slice %3 {offsets = [8, 0, 0], sizes = [1, 1, 256], strides = [1, 1, 1]} : vector<9x1x256xf32> to vector<1x1x256xf32>
    %96 = vector.shape_cast %95 : vector<1x1x256xf32> to vector<1x256xf32>
    %97 = vector.broadcast %96 : vector<1x256xf32> to vector<16x256xf32>
    %98 = arith.mulf %94, %97 : vector<16x256xf32>
    %99 = vector.extract_strided_slice %2 {offsets = [8, 0, 0], sizes = [1, 16, 1], strides = [1, 1, 1]} : vector<9x16x1xf32> to vector<1x16x1xf32>
    %100 = vector.shape_cast %99 : vector<1x16x1xf32> to vector<16x1xf32>
    %101 = vector.broadcast %100 : vector<16x1xf32> to vector<16x256xf32>
    %102 = arith.mulf %98, %101 : vector<16x256xf32>
    %103 = arith.addf %93, %102 : vector<16x256xf32>
    %104 = vector.broadcast %4 : vector<16x1xf32> to vector<16x256xf32>
    %105 = arith.addf %103, %104 : vector<16x256xf32>
    %cst_21 = arith.constant 5.000000e-01 : f32
    %106 = vector.broadcast %cst_21 : f32 to vector<16x256xf32>
    %107 = arith.mulf %106, %105 : vector<16x256xf32>
    %108 = math.tanh %107 : vector<16x256xf32>
    %cst_22 = arith.constant 5.000000e-01 : f32
    %109 = vector.broadcast %cst_22 : f32 to vector<16x256xf32>
    %110 = arith.mulf %109, %108 : vector<16x256xf32>
    %cst_23 = arith.constant 5.000000e-01 : f32
    %111 = vector.broadcast %cst_23 : f32 to vector<16x256xf32>
    %112 = arith.addf %110, %111 : vector<16x256xf32>
    %113 = arith.mulf %105, %112 : vector<16x256xf32>
    %cst_24 = arith.constant dense<0.000000e+00> : vector<4x256xf32>
    %114 = tpu.matmul %5, %113, %cst_24 {dimension_numbers = #tpu.dot_dimension_numbers<[1], [0], [0], [1], [0, 0, 1, 1], [], []>} : vector<4x16xf32>, vector<16x256xf32>, vector<4x256xf32> -> vector<4x256xf32>
    %115 = arith.addf %114, %1 : vector<4x256xf32>
    %116 = vector.broadcast %6 : vector<4x1xf32> to vector<4x256xf32>
    %117 = arith.addf %115, %116 : vector<4x256xf32>
    %c0_25 = arith.constant 0 : index
    %c0_26 = arith.constant 0 : index
    %c0_27 = arith.constant 0 : index
    %118 = vector.load %arg9[%c0_25, %c0_26, %c0_27] : memref<1x4x256xf32, #tpu.memory_space<vmem>>, vector<1x4x256xf32>
    %119 = vector.shape_cast %118 : vector<1x4x256xf32> to vector<4x256xf32>
    %120 = vector.shape_cast %117 : vector<4x256xf32> to vector<1x4x256xf32>
    tpu.vector_store %arg9[%c0_25, %c0_26, %c0_27], %120 {strides = array<i32>} : memref<1x4x256xf32, #tpu.memory_space<vmem>>, vector<1x4x256xf32>,
    return
  }
  func.func @transform_0(%arg0: i32) -> (i32, i32, i32) {
    %c0_i32 = arith.constant 0 : i32
    %c0_i32_0 = arith.constant 0 : i32
    %c0_i32_1 = arith.constant 0 : i32
    return %arg0, %c0_i32, %c0_i32_0 : i32, i32, i32
  }
  func.func @transform_1(%arg0: i32) -> (i32, i32) {
    %c0_i32 = arith.constant 0 : i32
    %c0_i32_0 = arith.constant 0 : i32
    %c0_i32_1 = arith.constant 0 : i32
    return %c0_i32, %c0_i32_0 : i32, i32
  }
  func.func @transform_2(%arg0: i32) -> (i32, i32) {
    %c0_i32 = arith.constant 0 : i32
    %c0_i32_0 = arith.constant 0 : i32
    %c0_i32_1 = arith.constant 0 : i32
    return %c0_i32, %c0_i32_0 : i32, i32
  }
  func.func @transform_3(%arg0: i32) -> (i32, i32, i32) {
    %c0_i32 = arith.constant 0 : i32
    %c0_i32_0 = arith.constant 0 : i32
    %c0_i32_1 = arith.constant 0 : i32
    %c0_i32_2 = arith.constant 0 : i32
    return %c0_i32, %c0_i32_0, %c0_i32_1 : i32, i32, i32
  }
  func.func @transform_4(%arg0: i32) -> (i32, i32, i32) {
    %c0_i32 = arith.constant 0 : i32
    %c0_i32_0 = arith.constant 0 : i32
    %c0_i32_1 = arith.constant 0 : i32
    %c0_i32_2 = arith.constant 0 : i32
    return %c0_i32, %c0_i32_0, %c0_i32_1 : i32, i32, i32
  }
  func.func @transform_5(%arg0: i32) -> (i32, i32) {
    %c0_i32 = arith.constant 0 : i32
    %c0_i32_0 = arith.constant 0 : i32
    %c0_i32_1 = arith.constant 0 : i32
    return %c0_i32, %c0_i32_0 : i32, i32
  }
  func.func @transform_6(%arg0: i32) -> (i32, i32) {
    %c0_i32 = arith.constant 0 : i32
    %c0_i32_0 = arith.constant 0 : i32
    %c0_i32_1 = arith.constant 0 : i32
    return %c0_i32, %c0_i32_0 : i32, i32
  }
  func.func @transform_7(%arg0: i32) -> (i32, i32) {
    %c0_i32 = arith.constant 0 : i32
    %c0_i32_0 = arith.constant 0 : i32
    %c0_i32_1 = arith.constant 0 : i32
    return %c0_i32, %c0_i32_0 : i32, i32
  }
  func.func @transform_8(%arg0: i32) -> (i32, i32, i32) {
    %c0_i32 = arith.constant 0 : i32
    %c0_i32_0 = arith.constant 0 : i32
    %c0_i32_1 = arith.constant 0 : i32
    return %arg0, %c0_i32, %c0_i32_0 : i32, i32, i32
  }
}

</mosaic_0001>

<bundles_post_ra>
// kernel: inverted_residual_pallas.1
= control target key start
LH: loop header
LB: loop body
LE: loop exit
PB: predicated region body
PF: predicated region fallthrough
CT: control target
= control target key end

     0   :  { %s1145_s27 = smov 0   ;;  %s1587_s0 = inlined_call_operand.vmem [shape: f32[2,4,256], index: 0, kind: input, shape index: {}]   ;;  %s1588_s1 = inlined_call_operand.vmem [shape: f32[16,4], index: 1, kind: input, shape index: {}]   ;;  %s1589_s2 = inlined_call_operand.vmem [shape: f32[16,1], index: 2, kind: input, shape index: {}]   ;;  %s1590_s3 = inlined_call_operand.vmem [shape: f32[9,16,1], index: 3, kind: input, shape index: {}]   ;;  %s1591_s4 = inlined_call_operand.vmem [shape: f32[9,1,256], index: 4, kind: input, shape index: {}]   ;;  %s1592_s5 = inlined_call_operand.vmem [shape: f32[16,1], index: 5, kind: input, shape index: {}]   ;;  %s1593_s6 = inlined_call_operand.vmem [shape: f32[4,16], index: 6, kind: input, shape index: {}]   ;;  %s1594_s7 = inlined_call_operand.vmem [shape: f32[4,1], index: 7, kind: input, shape index: {}]   ;;  %s1595_s8 = inlined_call_operand.vmem [shape: f32[2,4,256], index: 8, kind: output, shape index: {}]  }
   0x1 LB: > { %s1023_s28 = sadd.s32 4294967295, %s1088_s27   ;;  %p1027_p0 = scmp.ge.s32.totalorder %s1088_s27, 1  ;;  %s1088_s27 = sphi %s1145_s27, %s18_s27  }
   0x2   : > { %p262_p1 = scmp.lt.s32.totalorder %s1088_s27, 3 }
   0x4   : > { %p263_p2 = pnand %p1027_p0, %p262_p1 }
   0x6   : > { %266 = sbr.rel (%p263_p2) target bundleno = 700 (0x2bc), region = 52 }
   0xd   : > { %p296_p3 = scmp.lt.s32.totalorder %s1023_s28, 1  ;;  %v1090_v0 = vmov 0.0   ;;  %v339_v1 = vld [vmem:[%s1589_s2] sm:$0xff]  ;;  %v1091_v2 = vmov 0   ;;  %v340_v3 = vld [vmem:[%s1589_s2 + $0x8] sm:$0xff]  ;;  %vm360_vm0 = vcmask 1043456  }
   0xe   : > { %429 = vmatprep.mubr.f32.mxu0 %v1090_v0  ;;  %949 = vmatprep.mubr.f32.mxu1 %v1090_v0  ;;  %v307_v4 = vld [vmem:[%s1590_s3] sm:$0xff]  ;;  %v308_v6 = vld [vmem:[%s1590_s3 + $0x8] sm:$0xff]  ;;  %vm353_vm1 = vcmask 31744   ;;  %v309_v9 = vld [vmem:[%s1590_s3 + $0x10] sm:$0xff]  ;;  %s1092_s17 = smov 17   ;;  %s1093_s18 = smov 16  }
   0xf   : > { %s1628_s28 = smov (!%p296_p3, %s1023_s28), 1  ;;  %1063 = vset.pattern.permute.xlu0 %v1091_v2  ;;  %1064 = vset.pattern.permute.xlu1 %v1091_v2  ;;  %v337_v8 = vld [vmem:[%s1588_s1] sm:$0xff]  ;;  %v310_v10 = vld [vmem:[%s1590_s3 + $0x18] sm:$0xff]  ;;  %v338_v11 = vld [vmem:[%s1588_s1 + $0x8] sm:$0xff]  ;;  %s1094_s19 = smov 15   ;;  %vm881_vm10 = vcmask 130048  }
  0x10   : > { %343 = vperm.xlu0 %1063, %v339_v1   ;;  %s1039_s9 = sshll.u32 %s1628_s28, 3  ;;  %494 = vperm.xlu1 %1064, %v307_v4   ;;  %v311_v12 = vld [vmem:[%s1590_s3 + $0x20] sm:$0xff]  ;;  %v312_v13 = vld [vmem:[%s1590_s3 + $0x28] sm:$0xff]  ;;  %v313_v14 = vld [vmem:[%s1590_s3 + $0x30] sm:$0xff]  ;;  %s1095_s20 = smov 1  }
  0x11   : > { %s300_s16 = scalar_lea.vmem %s1587_s0, %s1039_s9  ;;  %v314_v15 = vld [vmem:[%s1590_s3 + $0x38] sm:$0xff]  ;;  %v315_v16 = vld [vmem:[%s1590_s3 + $0x40] sm:$0xff]  ;;  %v316_v17 = vld [vmem:[%s1590_s3 + $0x48] sm:$0xff]  ;;  %s1096_s21 = smov 127  }
  0x12   : > { %v1170_v5 = vld [vmem:[%s300_s16] sm:$0xff]  ;;  %v317_v18 = vld [vmem:[%s1590_s3 + $0x50] sm:$0xff]  ;;  %v318_v19 = vld [vmem:[%s1590_s3 + $0x58] sm:$0xff]  ;;  %s1097_s22 = smov 113   ;;  %s1098_s23 = smov 112  }
  0x13   : > { %1605 = vst [vmem:[#allocation2_spill] sm:$0xff] %v1170_v5  ;;  %v1177_v7 = vcombine.high %v1170_v5, %v1170_v5  ;;  %v319_v20 = vld [vmem:[%s1590_s3 + $0x60] sm:$0xff]  ;;  %v320_v21 = vld [vmem:[%s1590_s3 + $0x68] sm:$0xff]  ;;  %v321_v22 = vld [vmem:[%s1590_s3 + $0x70] sm:$0xff]  ;;  %s1099_s24 = smov 111   ;;  %s305_s13 = scalar_lea.vmem %s1595_s8, %s1039_s9 }
  0x14   : > { %348 = vperm.xlu0 %1063, %v340_v3   ;;  %499 = vperm.xlu1 %1064, %v308_v6   ;;  %v322_v23 = vld [vmem:[%s1590_s3 + $0x78] sm:$0xff]  ;;  %v323_v24 = vld [vmem:[%s1590_s3 + $0x80] sm:$0xff]  ;;  %v324_v25 = vld [vmem:[%s1590_s3 + $0x88] sm:$0xff] }
  0x15   : > { %1606 = vst [vmem:[#allocation3_spill] sm:$0xff] %v1177_v7  ;;  %1032 = vmatprep.subr.msk.mxu0 %vm360_vm0, %v1177_v7  ;;  %v333_v56 = vld [vmem:[%s1592_s5] sm:$0xff]  ;;  %v334_v58 = vld [vmem:[%s1592_s5 + $0x8] sm:$0xff] }
  0x16   : > { %1033 = vmatpush1.msk.msra.mxu0 %vm360_vm0, %v1170_v5  ;;  %v336_v59 = vld [vmem:[%s1594_s7] sm:$0xf] }
  0x17   : > { %1034 = vmatmul.mubr.msk.f32.vlgmr.msra.gmra.mrb[0].mxu0 %vm353_vm1, %v337_v8 }
  0x18   : > { %536 = vperm.xlu0 %1063, %v309_v9   ;;  %435 = vmatprep.mubr.f32.mxu0 %v1090_v0 }
  0x19   : > { %541 = vperm.xlu1 %1064, %v310_v10  }
  0x1b   : > { %1035 = vmatmul.mubr.msk.f32.gmra.mrb[2].mxu0 %vm353_vm1, %v338_v11 }
  0x1c   : > { %582 = vperm.xlu0 %1063, %v311_v12  }
  0x1d   : > { %587 = vperm.xlu1 %1064, %v312_v13  }
  0x20   : > { %628 = vperm.xlu0 %1063, %v313_v14  }
  0x21   : > { %633 = vperm.xlu1 %1064, %v314_v15  }
  0x24   : > { %646 = vperm.xlu0 %1063, %v315_v16  }
  0x25   : > { %651 = vperm.xlu1 %1064, %v316_v17  }
  0x28   : > { %692 = vperm.xlu0 %1063, %v317_v18  }
  0x29   : > { %697 = vperm.xlu1 %1064, %v318_v19  }
  0x2c   : > { %738 = vperm.xlu0 %1063, %v319_v20  }
  0x2d   : > { %743 = vperm.xlu1 %1064, %v320_v21  }
  0x30   : > { %784 = vperm.xlu0 %1063, %v321_v22  }
  0x31   : > { %789 = vperm.xlu1 %1064, %v322_v23  }
  0x34   : > { %830 = vperm.xlu0 %1063, %v323_v24  }
  0x35   : > { %835 = vperm.xlu1 %1064, %v324_v25  }
  0x8f   : > { %v344_v26 = vpop.permute.xlu0 %343  ;;  %v1293_v57 = vpop.permute.xlu1 %494 }
  0x93   : > { %v349_v31 = vpop.permute.xlu0 %348  ;;  %v1304_v61 = vpop.permute.xlu1 %499 }
  0x97   : > { %v1302_v60 = vpop.permute.xlu0 %536 }
  0x98   : > { %v1308_v63 = vpop.permute.xlu1 %541 }
  0x9b   : > { %v1306_v62 = vpop.permute.xlu0 %582 }
  0x9c   : > { %v1312_v1 = vpop.permute.xlu1 %587 }
  0x9f   : > { %v1310_v0 = vpop.permute.xlu0 %628 }
  0xa0   : > { %v1314_v3 = vpop.permute.xlu1 %633 }
  0xa3   : > { %v647_v2 = vpop.permute.xlu0 %646 }
  0xa4   : > { %v652_v6 = vpop.permute.xlu1 %651 }
  0xa7   : > { %v1316_v4 = vpop.permute.xlu0 %692 }
  0xa8   : > { %v1318_v8 = vpop.permute.xlu1 %697 }
  0xa9   : > { %1607 = vst [vmem:[#allocation4_spill] sm:$0xff] %v1318_v8 }
  0xab   : > { %v1320_v9 = vpop.permute.xlu0 %738 }
  0xac   : > { %v1322_v10 = vpop.permute.xlu1 %743 }
  0xad   : > { %1608 = vst [vmem:[#allocation5_spill] sm:$0xff] %v1322_v10 }
  0xaf   : > { %v1324_v11 = vpop.permute.xlu0 %784 }
  0xb0   : > { %1609 = vst [vmem:[#allocation6_spill] sm:$0xff] %v1324_v11  ;;  %v1326_v12 = vpop.permute.xlu1 %789 }
  0xb1   : > { %1610 = vst [vmem:[#allocation7_spill] sm:$0xff] %v1326_v12 }
  0xb3   : > { %v1328_v13 = vpop.permute.xlu0 %830 }
  0xb4   : > { %1611 = vst [vmem:[#allocation8_spill] sm:$0xff] %v1328_v13  ;;  %v1330_v14 = vpop.permute.xlu1 %835 }
  0xb5   : > { %1612 = vst [vmem:[#allocation9_spill] sm:$0xff] %v1330_v14 }
  0xea   : > { %v431_v27 = vpop.f32.mrb[0].mxu0 }
  0xeb   : > { %v432_v28 = vadd.f32 %v431_v27, %v344_v26  ;;  %v433_v29 = vpop.f32.mrb[1].mxu0 }
  0xec   : > { %v434_v43 = vadd.f32 %v433_v29, %v344_v26 }
  0xed   : > { %v442_v30 = vmul.f32 0.5, %v432_v28 }
  0xee   : > { %v437_v32 = vpop.f32.mrb[2].mxu0  ;;  %v443_v45 = vmul.f32 0.5, %v434_v43 }
  0xef   : > { %1066 = vtanh.f32 %v442_v30  ;;  %v438_v33 = vadd.f32 %v437_v32, %v349_v31  ;;  %v439_v34 = vpop.f32.mrb[3].mxu0  ;;  %v470_v30 = vlaneseq }
  0xf0   : > { %v440_v46 = vadd.f32 %v439_v34, %v349_v31 }
  0xf1   : > { %v444_v35 = vmul.f32 0.5, %v438_v33  ;;  %v479_v32 = vshrl.u32 %v470_v30, 7  ;;  %v1358_v34 = vand.u32 127, %v470_v30 }
  0xf2   : > { %v445_v47 = vmul.f32 0.5, %v440_v46 }
  0xf3   : > { %1068 = vtanh.f32 %v444_v35  ;;  %v1360_v35 = vsub.s32 0, %v479_v32  ;;  %vm514_vm2 = vcmp.lt.s32.totalorder %v1358_v34, 16  ;;  %vm472_vm3 = vcmp.lt.s32.totalorder %v1358_v34, 17 }
  0xf4   : > { %1070 = vtanh.f32 %v443_v45  ;;  %vm560_vm4 = vcmp.lt.s32.totalorder %v1358_v34, 15  ;;  %vm606_vm5 = vcmp.lt.s32.totalorder %v1358_v34, 1  ;;  %vm670_vm6 = vcmp.lt.s32.totalorder %v1358_v34, 127 }
  0xf5   : > { %1072 = vtanh.f32 %v445_v47  ;;  %vm716_vm7 = vcmp.lt.s32.totalorder %v1358_v34, 113  ;;  %vm762_vm8 = vcmp.lt.s32.totalorder %v1358_v34, 112  ;;  %vm808_vm9 = vcmp.lt.s32.totalorder %v1358_v34, 111 }
  0xf9   : > { %v1067_v36 = vpop.eup %1066 }
  0xfa   : > { %v450_v37 = vmul.f32 0.5, %v1067_v36  ;;  %v1362_v36 = vsub.s32 1, %v479_v32 }
  0xfc   : > { %v454_v38 = vadd.f32 0.5, %v450_v37 }
  0xfd   : > { %v1069_v39 = vpop.eup %1068 }
  0xfe   : > { %v1235_v40 = vmul.f32 %v454_v38, %v432_v28  ;;  %v452_v41 = vmul.f32 0.5, %v1069_v39  ;;  %v1071_v48 = vpop.eup %1070  ;;  %v325_v39 = vld [vmem:[%s1591_s4] sm:$0x3] }
  0xff   : > { %v451_v49 = vmul.f32 0.5, %v1071_v48  ;;  %v1073_v50 = vpop.eup %1072  ;;  %v481_v48 = vrot.slane %v325_v39, %v1360_v35 }
 0x100   : > { %v456_v42 = vadd.f32 0.5, %v452_v41  ;;  %462 = vrot.lane.b32.xlu0 %v1235_v40, %s1092_s17  ;;  %v453_v52 = vmul.f32 0.5, %v1073_v50  ;;  %v326_v41 = vld [vmem:[%s1591_s4 + $0x2] sm:$0x3] }
 0x101   : > { %v455_v51 = vadd.f32 0.5, %v451_v49  ;;  %v485_v49 = vrot.slane %v325_v39, %v1362_v36  ;;  %v523_v50 = vrot.slane %v326_v41, %v1360_v35 }
 0x102   : > { %v1239_v44 = vmul.f32 %v456_v42, %v438_v33  ;;  %v457_v54 = vadd.f32 0.5, %v453_v52  ;;  %v327_v42 = vld [vmem:[%s1591_s4 + $0x4] sm:$0x3] }
 0x103   : > { %v1262_v53 = vmul.f32 %v455_v51, %v434_v43  ;;  %v1375_v43 = vmul.f32 %v647_v2, %v1235_v40 }
 0x104   : > { %464 = vrot.lane.b32.xlu1 %v1239_v44, %s1092_s17  ;;  %506 = vrot.lane.b32.xlu0 %v1235_v40, %s1093_s18  ;;  %v1267_v55 = vmul.f32 %v457_v54, %v440_v46  ;;  %v1378_v45 = vmul.f32 %v652_v6, %v1239_v44  ;;  %v329_v54 = vld [vmem:[%s1591_s4 + $0xa] sm:$0x3] }
 0x105   : > { %v1385_v47 = vmul.f32 %v647_v2, %v1262_v53  ;;  %v573_v2 = vrot.slane %v327_v42, %v1362_v36  ;;  %v1416_v32 = vrot.slane %v329_v54, %v1360_v35  ;;  %v1423_v14 = vrot.slane %v329_v54, %v1362_v36 }
 0x106   : > { %1614 = vst [vmem:[#allocation11_spill] sm:$0xff] %v1378_v45  ;;  %v1381_v46 = vmul.f32 %v652_v6, %v1267_v55  ;;  %v330_v6 = vld [vmem:[%s1591_s4 + $0xc] sm:$0x3] }
 0x108   : > { %508 = vrot.lane.b32.xlu1 %v1239_v44, %s1093_s18  ;;  %552 = vrot.lane.b32.xlu0 %v1235_v40, %s1094_s19  ;;  %1615 = vst [vmem:[#allocation12_spill] sm:$0xff] %v1381_v46 }
 0x10c   : > { %554 = vrot.lane.b32.xlu1 %v1239_v44, %s1094_s19  ;;  %598 = vrot.lane.b32.xlu0 %v1235_v40, %s1095_s20 }
 0x110   : > { %600 = vrot.lane.b32.xlu1 %v1239_v44, %s1095_s20  ;;  %662 = vrot.lane.b32.xlu0 %v1235_v40, %s1096_s21 }
 0x114   : > { %664 = vrot.lane.b32.xlu1 %v1239_v44, %s1096_s21  ;;  %708 = vrot.lane.b32.xlu0 %v1235_v40, %s1097_s22 }
 0x118   : > { %710 = vrot.lane.b32.xlu1 %v1239_v44, %s1097_s22  ;;  %754 = vrot.lane.b32.xlu0 %v1235_v40, %s1098_s23 }
 0x11c   : > { %756 = vrot.lane.b32.xlu1 %v1239_v44, %s1098_s23  ;;  %800 = vrot.lane.b32.xlu0 %v1235_v40, %s1099_s24  ;;  %v527_v40 = vrot.slane %v326_v41, %v1362_v36 }
 0x120   : > { %802 = vrot.lane.b32.xlu1 %v1239_v44, %s1099_s24  ;;  %466 = vrot.lane.b32.xlu0 %v1262_v53, %s1092_s17  ;;  %v328_v44 = vld [vmem:[%s1591_s4 + $0x6] sm:$0x3] }
 0x121   : > { %v619_v30 = vrot.slane %v328_v44, %v1362_v36 }
 0x124   : > { %468 = vrot.lane.b32.xlu1 %v1267_v55, %s1092_s17  ;;  %510 = vrot.lane.b32.xlu0 %v1262_v53, %s1093_s18 }
 0x128   : > { %512 = vrot.lane.b32.xlu1 %v1267_v55, %s1093_s18  ;;  %556 = vrot.lane.b32.xlu0 %v1262_v53, %s1094_s19 }
 0x12c   : > { %558 = vrot.lane.b32.xlu1 %v1267_v55, %s1094_s19  ;;  %602 = vrot.lane.b32.xlu0 %v1262_v53, %s1095_s20 }
 0x130   : > { %604 = vrot.lane.b32.xlu1 %v1267_v55, %s1095_s20  ;;  %666 = vrot.lane.b32.xlu0 %v1262_v53, %s1096_s21 }
 0x134   : > { %668 = vrot.lane.b32.xlu1 %v1267_v55, %s1096_s21  ;;  %712 = vrot.lane.b32.xlu0 %v1262_v53, %s1097_s22 }
 0x138   : > { %714 = vrot.lane.b32.xlu1 %v1267_v55, %s1097_s22  ;;  %758 = vrot.lane.b32.xlu0 %v1262_v53, %s1098_s23 }
 0x13c   : > { %760 = vrot.lane.b32.xlu1 %v1267_v55, %s1098_s23  ;;  %804 = vrot.lane.b32.xlu0 %v1262_v53, %s1099_s24 }
 0x140   : > { %806 = vrot.lane.b32.xlu1 %v1267_v55, %s1099_s24  ;;  %848 = vperm.xlu0 %1063, %v333_v56   ;;  %v569_v56 = vrot.slane %v327_v42, %v1360_v35 }
 0x144   : > { %853 = vperm.xlu1 %1064, %v334_v58   ;;  %958 = vperm.xlu0 %1063, %v336_v59  }
 0x172   : > { %v463_v15 = vpop.permute.xlu0 %462 }
 0x176   : > { %v1332_v16 = vpop.permute.xlu1 %464  ;;  %v507_v17 = vpop.permute.xlu0 %506 }
 0x17a   : > { %v1334_v18 = vpop.permute.xlu1 %508  ;;  %v553_v19 = vpop.permute.xlu0 %552 }
 0x17e   : > { %v1336_v20 = vpop.permute.xlu1 %554  ;;  %v1338_v21 = vpop.permute.xlu0 %598 }
 0x182   : > { %v1340_v22 = vpop.permute.xlu1 %600  ;;  %v1342_v23 = vpop.permute.xlu0 %662 }
 0x186   : > { %v1344_v24 = vpop.permute.xlu1 %664  ;;  %v1346_v25 = vpop.permute.xlu0 %708 }
 0x18a   : > { %v1348_v26 = vpop.permute.xlu1 %710  ;;  %v1350_v27 = vpop.permute.xlu0 %754 }
 0x18e   : > { %v1352_v28 = vpop.permute.xlu1 %756  ;;  %v1354_v29 = vpop.permute.xlu0 %800 }
 0x192   : > { %v1356_v31 = vpop.permute.xlu1 %802  ;;  %v467_v33 = vpop.permute.xlu0 %466 }
 0x193   : > { %1613 = vst [vmem:[#allocation10_spill] sm:$0xff] %v1356_v31  ;;  %v473_v58 = vsel %vm472_vm3, %v463_v15, %v467_v33  ;;  %v475_v59 = vsel %vm472_vm3, %v467_v33, %v463_v15 }
 0x194   : > { %v488_v7 = vmul.f32 %v481_v48, %v475_v59  ;;  %v489_v5 = vmul.f32 %v485_v49, %v473_v58 }
 0x196   : > { %v469_v37 = vpop.permute.xlu1 %468  ;;  %v511_v38 = vpop.permute.xlu0 %510 }
 0x197   : > { %v515_v53 = vsel %vm514_vm2, %v507_v17, %v511_v38  ;;  %v517_v55 = vsel %vm514_vm2, %v511_v38, %v507_v17  ;;  %v615_v17 = vrot.slane %v328_v44, %v1360_v35  ;;  %v1426_v44 = vrot.slane %v330_v6, %v1360_v35 }
 0x198   : > { %v530_v38 = vmul.f32 %v523_v50, %v517_v55  ;;  %v531_v39 = vmul.f32 %v527_v40, %v515_v53  ;;  %v331_v53 = vld [vmem:[%s1591_s4 + $0xe] sm:$0x3]  ;;  %v474_v55 = vsel %vm472_vm3, %v1332_v16, %v469_v37 }
 0x19a   : > { %v513_v51 = vpop.permute.xlu1 %512  ;;  %v557_v52 = vpop.permute.xlu0 %556 }
 0x19b   : > { %v561_v15 = vsel %vm560_vm4, %v553_v19, %v557_v52  ;;  %v563_v33 = vsel %vm560_vm4, %v557_v52, %v553_v19  ;;  %v476_v19 = vsel %vm472_vm3, %v469_v37, %v1332_v16  ;;  %v516_v52 = vsel %vm514_vm2, %v1334_v18, %v513_v51 }
 0x19c   : > { %v518_v54 = vsel %vm514_vm2, %v513_v51, %v1334_v18  ;;  %v576_v58 = vmul.f32 %v569_v56, %v563_v33  ;;  %v577_v59 = vmul.f32 %v573_v2, %v561_v15  ;;  %v544_v16 = vmul.f32 %v1302_v60, %v530_v38 }
 0x19d   : > { %v545_v37 = vmul.f32 %v1302_v60, %v531_v39  ;;  %v1453_v18 = vrot.slane %v330_v6, %v1362_v36  ;;  %v1456_v51 = vrot.slane %v331_v53, %v1360_v35  ;;  %v502_v15 = vmul.f32 %v1293_v57, %v488_v7 }
 0x19e   : > { %v559_v41 = vpop.permute.xlu1 %558  ;;  %v603_v42 = vpop.permute.xlu0 %602  ;;  %v503_v33 = vmul.f32 %v1293_v57, %v489_v5  ;;  %v491_v38 = vmul.f32 %v485_v49, %v474_v55  ;;  %v532_v8 = vmul.f32 %v523_v50, %v518_v54  ;;  %v533_v60 = vmul.f32 %v527_v40, %v516_v52 }
 0x19f   : > { %v607_v12 = vsel %vm606_vm5, %v1338_v21, %v603_v42  ;;  %v609_v13 = vsel %vm606_vm5, %v603_v42, %v1338_v21  ;;  %v490_v42 = vmul.f32 %v481_v48, %v476_v19  ;;  %v590_v39 = vmul.f32 %v1306_v62, %v576_v58  ;;  %v332_v19 = vld [vmem:[%s1591_s4 + $0x10] sm:$0x3] }
 0x1a0   : > { %v622_v31 = vmul.f32 %v615_v17, %v609_v13  ;;  %v623_v21 = vmul.f32 %v619_v30, %v607_v12  ;;  %v591_v45 = vmul.f32 %v1306_v62, %v577_v59  ;;  %v562_v6 = vsel %vm560_vm4, %v1336_v20, %v559_v41 }
 0x1a1   : > { %v564_v7 = vsel %vm560_vm4, %v559_v41, %v1336_v20  ;;  %v548_v46 = vadd.f32 %v544_v16, %v502_v15  ;;  %v549_v5 = vadd.f32 %v545_v37, %v503_v33  ;;  %v579_v41 = vmul.f32 %v573_v2, %v562_v6 }
 0x1a2   : > { %v605_v10 = vpop.permute.xlu1 %604  ;;  %v667_v11 = vpop.permute.xlu0 %666  ;;  %v636_v48 = vmul.f32 %v1310_v0, %v622_v31  ;;  %v637_v49 = vmul.f32 %v1310_v0, %v623_v21  ;;  %v578_v40 = vmul.f32 %v569_v56, %v564_v7  ;;  %v547_v31 = vmul.f32 %v1308_v63, %v533_v60 }
 0x1a3   : > { %v608_v57 = vsel %vm606_vm5, %v1340_v22, %v605_v10  ;;  %v610_v12 = vsel %vm606_vm5, %v605_v10, %v1340_v22  ;;  %v671_v20 = vsel %vm670_vm6, %v1342_v23, %v667_v11  ;;  %v673_v50 = vsel %vm670_vm6, %v667_v11, %v1342_v23 }
 0x1a4   : > { %v1484_v10 = vrot.slane %v331_v53, %v1362_v36  ;;  %v546_v22 = vmul.f32 %v1308_v63, %v532_v8  ;;  %v594_v0 = vadd.f32 %v590_v39, %v548_v46  ;;  %v595_v55 = vadd.f32 %v591_v45, %v549_v5 }
 0x1a5   : > { %v624_v52 = vmul.f32 %v615_v17, %v610_v12  ;;  %v625_v54 = vmul.f32 %v619_v30, %v608_v57  ;;  %v686_v11 = vmul.f32 %v1416_v32, %v671_v20  ;;  %v687_v23 = vmul.f32 %v1423_v14, %v673_v50 }
 0x1a6   : > { %v669_v13 = vpop.permute.xlu1 %668  ;;  %v713_v62 = vpop.permute.xlu0 %712  ;;  %v504_v53 = vmul.f32 %v1304_v61, %v490_v42  ;;  %v505_v8 = vmul.f32 %v1304_v61, %v491_v38  ;;  %v640_v58 = vadd.f32 %v636_v48, %v594_v0  ;;  %v641_v63 = vadd.f32 %v637_v49, %v595_v55 }
 0x1a7   : > { %v592_v45 = vmul.f32 %v1312_v1, %v578_v40  ;;  %v593_v46 = vmul.f32 %v1312_v1, %v579_v41  ;;  %v817_v59 = vrot.slane %v332_v19, %v1360_v35  ;;  %v821_v17 = vrot.slane %v332_v19, %v1362_v36 }
 0x1a8   : > { %v550_v30 = vadd.f32 %v546_v22, %v504_v53  ;;  %v551_v16 = vadd.f32 %v547_v31, %v505_v8  ;;  %v717_v37 = vsel %vm716_vm7, %v1346_v25, %v713_v62  ;;  %v719_v61 = vsel %vm716_vm7, %v713_v62, %v1346_v25 }
 0x1a9   : > { %v638_v15 = vmul.f32 %v1314_v3, %v624_v52  ;;  %v639_v33 = vmul.f32 %v1314_v3, %v625_v54  ;;  %v700_v1 = vmul.f32 %v1316_v4, %v686_v11  ;;  %v701_v35 = vmul.f32 %v1316_v4, %v687_v23  ;;  %v1618_v52 = vld [vmem:[#allocation4_spill] sm:$0xff]  ;;  %v1619_v23 = vld [vmem:[#allocation10_spill] sm:$0xff] }
 0x1aa   : > { %v715_v56 = vpop.permute.xlu1 %714  ;;  %v759_v2 = vpop.permute.xlu0 %758  ;;  %v659_v36 = vadd.f32 %v1385_v47, %v641_v63  ;;  %v658_v42 = vadd.f32 %v1375_v43, %v640_v58  ;;  %v672_v38 = vsel %vm670_vm6, %v1344_v24, %v669_v13  ;;  %v674_v25 = vsel %vm670_vm6, %v669_v13, %v1344_v24 }
 0x1ab   : > { %v596_v60 = vadd.f32 %v592_v45, %v550_v30  ;;  %v597_v39 = vadd.f32 %v593_v46, %v551_v16  ;;  %v732_v3 = vmul.f32 %v1426_v44, %v717_v37  ;;  %v733_v6 = vmul.f32 %v1453_v18, %v719_v61  ;;  %v1621_v46 = vld [vmem:[#allocation5_spill] sm:$0xff]  ;;  %v1622_v37 = vld [vmem:[#allocation8_spill] sm:$0xff] }
 0x1ac   : > { %v718_v47 = vsel %vm716_vm7, %v1348_v26, %v715_v56  ;;  %v720_v43 = vsel %vm716_vm7, %v715_v56, %v1348_v26  ;;  %v763_v7 = vsel %vm762_vm8, %v1350_v27, %v759_v2  ;;  %v765_v24 = vsel %vm762_vm8, %v759_v2, %v1350_v27  ;;  %v1620_v2 = vld [vmem:[#allocation6_spill] sm:$0xff] }
 0x1ad   : > { %v642_v5 = vadd.f32 %v638_v15, %v596_v60  ;;  %v643_v57 = vadd.f32 %v639_v33, %v597_v39  ;;  %v688_v12 = vmul.f32 %v1416_v32, %v672_v38  ;;  %v689_v13 = vmul.f32 %v1423_v14, %v674_v25 }
 0x1ae   : > { %v761_v21 = vpop.permute.xlu1 %760  ;;  %v805_v4 = vpop.permute.xlu0 %804  ;;  %v704_v62 = vadd.f32 %v700_v1, %v658_v42  ;;  %v705_v48 = vadd.f32 %v701_v35, %v659_v36  ;;  %v734_v20 = vmul.f32 %v1426_v44, %v718_v47  ;;  %v735_v27 = vmul.f32 %v1453_v18, %v720_v43  ;;  %v1616_v44 = vld [vmem:[#allocation12_spill] sm:$0xff]  ;;  %v1617_v18 = vld [vmem:[#allocation11_spill] sm:$0xff] }
 0x1af   : > { %v809_v26 = vsel %vm808_vm9, %v1354_v29, %v805_v4  ;;  %v811_v49 = vsel %vm808_vm9, %v805_v4, %v1354_v29  ;;  %v778_v50 = vmul.f32 %v1456_v51, %v763_v7  ;;  %v779_v32 = vmul.f32 %v1484_v10, %v765_v24 }
 0x1b0   : > { %v746_v14 = vmul.f32 %v1320_v9, %v732_v3  ;;  %v747_v41 = vmul.f32 %v1320_v9, %v733_v6  ;;  %v764_v22 = vsel %vm762_vm8, %v1352_v28, %v761_v21  ;;  %v766_v29 = vsel %vm762_vm8, %v761_v21, %v1352_v28  ;;  %v1623_v21 = vld [vmem:[#allocation7_spill] sm:$0xff]  ;;  %v1624_v3 = vld [vmem:[#allocation9_spill] sm:$0xff] }
 0x1b1   : > { %v661_v31 = vadd.f32 %v1616_v44, %v643_v57  ;;  %v660_v0 = vadd.f32 %v1617_v18, %v642_v5  ;;  %v824_v55 = vmul.f32 %v817_v59, %v809_v26  ;;  %v825_v19 = vmul.f32 %v821_v17, %v811_v49 }
 0x1b2   : > { %v807_v40 = vpop.permute.xlu1 %806  ;;  %v702_v54 = vmul.f32 %v1618_v52, %v688_v12  ;;  %v703_v11 = vmul.f32 %v1618_v52, %v689_v13  ;;  %v792_v28 = vmul.f32 %v1620_v2, %v778_v50  ;;  %v793_v53 = vmul.f32 %v1620_v2, %v779_v32 }
 0x1b3   : > { %v810_v9 = vsel %vm808_vm9, %v1619_v23, %v807_v40  ;;  %v812_v56 = vsel %vm808_vm9, %v807_v40, %v1619_v23  ;;  %v780_v8 = vmul.f32 %v1456_v51, %v764_v22  ;;  %v781_v58 = vmul.f32 %v1484_v10, %v766_v29  ;;  %v335_v23 = vld [vmem:[%s1593_s6] sm:$0xf] }
 0x1b4   : > { %v750_v63 = vadd.f32 %v746_v14, %v704_v62  ;;  %v751_v45 = vadd.f32 %v747_v41, %v705_v48  ;;  %v748_v30 = vmul.f32 %v1621_v46, %v734_v20  ;;  %v749_v16 = vmul.f32 %v1621_v46, %v735_v27 }
 0x1b5   : > { %v838_v61 = vmul.f32 %v1622_v37, %v824_v55  ;;  %v839_v15 = vmul.f32 %v1622_v37, %v825_v19  ;;  %v826_v34 = vmul.f32 %v817_v59, %v810_v9  ;;  %v827_v33 = vmul.f32 %v821_v17, %v812_v56  ;;  %v1625_v56 = vld [vmem:[#allocation2_spill] sm:$0xff] }
 0x1b6   : > { %v706_v1 = vadd.f32 %v702_v54, %v660_v0  ;;  %v707_v35 = vadd.f32 %v703_v11, %v661_v31  ;;  %v794_v36 = vmul.f32 %v1623_v21, %v780_v8  ;;  %v795_v51 = vmul.f32 %v1623_v21, %v781_v58  ;;  %v1626_v8 = vld [vmem:[#allocation3_spill] sm:$0xff] }
 0x1b7   : > { %v797_v42 = vadd.f32 %v793_v53, %v751_v45  ;;  %v796_v10 = vadd.f32 %v792_v28, %v750_v63  ;;  %v840_v6 = vmul.f32 %v1624_v3, %v826_v34  ;;  %v841_v4 = vmul.f32 %v1624_v3, %v827_v33 }
 0x1b8   : > { %v753_v38 = vadd.f32 %v749_v16, %v707_v35  ;;  %v752_v25 = vadd.f32 %v748_v30, %v706_v1 }
 0x1b9   : > { %v843_v60 = vadd.f32 %v839_v15, %v797_v42  ;;  %v842_v39 = vadd.f32 %v838_v61, %v796_v10 }
 0x1ba   : > { %v799_v17 = vadd.f32 %v795_v51, %v753_v38  ;;  %v798_v7 = vadd.f32 %v794_v36, %v752_v25 }
 0x1bc   : > { %v845_v57 = vadd.f32 %v841_v4, %v799_v17  ;;  %v844_v12 = vadd.f32 %v840_v6, %v798_v7 }
 0x1bf   : > { %v849_v47 = vpop.permute.xlu0 %848 }
 0x1c0   : > { %v856_v43 = vadd.f32 %v849_v47, %v842_v39  ;;  %v857_v59 = vadd.f32 %v849_v47, %v843_v60 }
 0x1c2   : > { %v860_v24 = vmul.f32 0.5, %v856_v43  ;;  %v861_v5 = vmul.f32 0.5, %v857_v59 }
 0x1c3   : > { %v854_v13 = vpop.permute.xlu1 %853  ;;  %v959_v53 = vpop.permute.xlu0 %958 }
 0x1c4   : > { %1074 = vtanh.f32 %v860_v24  ;;  %v858_v62 = vadd.f32 %v854_v13, %v844_v12  ;;  %v859_v48 = vadd.f32 %v854_v13, %v845_v57 }
 0x1c5   : > { %1076 = vtanh.f32 %v861_v5 }
 0x1c6   : > { %v862_v26 = vmul.f32 0.5, %v858_v62  ;;  %v863_v49 = vmul.f32 0.5, %v859_v48 }
 0x1c8   : > { %1078 = vtanh.f32 %v862_v26 }
 0x1c9   : > { %1080 = vtanh.f32 %v863_v49 }
 0x1ce   : > { %v1075_v20 = vpop.eup %1074 }
 0x1cf   : > { %v1077_v27 = vpop.eup %1076  ;;  %v868_v50 = vmul.f32 0.5, %v1075_v20 }
 0x1d0   : > { %v869_v32 = vmul.f32 0.5, %v1077_v27 }
 0x1d1   : > { %v872_v22 = vadd.f32 0.5, %v868_v50 }
 0x1d2   : > { %v1079_v40 = vpop.eup %1078  ;;  %v873_v44 = vadd.f32 0.5, %v869_v32 }
 0x1d3   : > { %v1081_v14 = vpop.eup %1080  ;;  %v870_v41 = vmul.f32 0.5, %v1079_v40  ;;  %v876_v55 = vmul.f32 %v872_v22, %v856_v43 }
 0x1d4   : > { %v871_v29 = vmul.f32 0.5, %v1081_v14  ;;  %v877_v19 = vmul.f32 %v873_v44, %v857_v59 }
 0x1d5   : > { %v874_v31 = vadd.f32 0.5, %v870_v41 }
 0x1d6   : > { %v875_v18 = vadd.f32 0.5, %v871_v29 }
 0x1d7   : > { %v878_v0 = vmul.f32 %v874_v31, %v858_v62 }
 0x1d8   : > { %v879_v52 = vmul.f32 %v875_v18, %v859_v48 }
 0x1d9   : > { %v1043_v54 = vpack.c.bf16 %v878_v0, %v876_v55 }
 0x1da   : > { %v1041_v11 = vpack.c.bf16 %v879_v52, %v877_v19 }
 0x1dc   : > { %1042 = vmatprep.subr.bf16.mxu1 %v1041_v11 }
 0x1dd   : > { %1044 = vmatpush1.bf16.msra.mxu1 %v1043_v54 }
 0x1e0   : > { %1036 = vmatmul.mubr.msk.f32.vlgmr.msra.gmra.mrb[0].mxu1 %vm881_vm10, %v335_v23 }
 0x2b3   : > { %v951_v9 = vpop.f32.mrb[0].mxu1 }
 0x2b4   : > { %v952_v2 = vadd.f32 %v951_v9, %v1625_v56  ;;  %v953_v28 = vpop.f32.mrb[1].mxu1 }
 0x2b5   : > { %v954_v58 = vadd.f32 %v953_v28, %v1626_v8 }
 0x2b6   : > { %v961_v63 = vadd.f32 %v959_v53, %v952_v2 }
 0x2b7   : > { %v962_v45 = vadd.f32 %v959_v53, %v954_v58 }
 0x2b9   : > { %v965_v46 = vcombine.low %v961_v63, %v962_v45 }
 0x2bb   : > { %967 = vst [vmem:[%s305_s13] sm:$0xff] %v965_v46 }
 0x2bc PF: > { %s18_s27 = sadd.s32 1, %s1088_s27  }
 0x2bd   : > { %p15_p4 = scmp.ge.s32.totalorder %s18_s27, 4  }
 0x2bf   :  { %17 = sbr.rel (!%p15_p4) target bundleno = 1 (0x1), region = 82 }

</bundles_post_ra>
